<compile_context>
chip_gen: v6e
topology: v6e:2x2x1
jax: 0.10.0
libtpu: 0.0.40
codegen_flags: <defaults>
</compile_context>

<pallas_src>
import jax
import jax.numpy as jnp
from jax import lax
from jax.experimental import pallas as pl
from jax.experimental.pallas import tpu as pltpu

EPS = 1e-5
HDN = 32
B_MAX = 128          # per-grid-step batch block (bf16 working set ~few MB << 64 MiB v7x VMEM)
PAD_ROWS = 16        # row padding used for the shifted-slice im2col trick

# Static layer configs: (Cin, Cout, K, stride) — mirrors the PyTorch module.
_CONV_CFGS = ((10, HDN, 13, 2),
              (HDN, 2 * HDN, 7, 2),
              (2 * HDN, 2 * HDN, 5, 1),
              (2 * HDN, 2 * HDN, 3, 1))


# --------------------------- parameter preparation ---------------------------

def init_params(key):
    params = {'convs': []}
    for (cin, cout, k, _s) in _CONV_CFGS:
        key, kw, kg, kb, km, kv = jax.random.split(key, 6)
        w = jax.random.normal(kw, (cout, cin, k), jnp.float32) / jnp.sqrt(cin * k)
        gamma = 1.0 + 0.1 * jax.random.normal(kg, (cout,), jnp.float32)
        beta = 0.1 * jax.random.normal(kb, (cout,), jnp.float32)
        mean = 0.1 * jax.random.normal(km, (cout,), jnp.float32)
        var = jax.random.uniform(kv, (cout,), jnp.float32, 0.5, 1.5)
        params['convs'].append(dict(w=w, gamma=gamma, beta=beta, mean=mean, var=var))
    key, k5w, k5b = jax.random.split(key, 3)
    params['w5'] = jax.random.normal(k5w, (2 * HDN, 10), jnp.float32) / jnp.sqrt(2 * HDN)
    params['b5'] = 0.1 * jax.random.normal(k5b, (10,), jnp.float32)
    return params


def fold_params(params, L):
    """One-time prep.  Re-expresses the net so every in-kernel stage is a
    stride-1 conv == one 2-D matmul over an im2col lane-concat:
      * input is quad-merged (4 positions -> lanes)  -> layer-1 stride-2 removed
      * layer-1 output is pair-merged (2 positions)  -> layer-2 stride-2 removed
      * BN folded into conv weights/biases; mean-pool 1/L folded into fc5.
    Returns (ops, meta): ops = flat list of kernel operands (bf16 weights,
    f32 biases), meta = static kernel configuration."""
    (cin1, c1, K1, s1), (_c1, c2, K2, s2), (_c2, c3, K3, s3), (_c3, c4, K4, s4) = _CONV_CFGS
    assert (s1, s2, s3, s4) == (2, 2, 1, 1) and L % 4 == 0

    # BN-folded per-layer weights (K, Cin, Cout) and biases (Cout,)
    Wf, Bf = [], []
    for layer in params['convs']:
        s = layer['gamma'] / jnp.sqrt(layer['var'] + EPS)
        Wf.append(jnp.transpose(layer['w'], (2, 1, 0)) * s[None, None, :])
        Bf.append(layer['beta'] - layer['mean'] * s)

    P = L // 4                              # rows per sample inside the kernel (16)
    assert P % 8 == 0
    l1 = (L - K1) // 2 + 1                  # original layer-1 output length (26)
    assert l1 % 2 == 0                      # required for pair-merging

    # ---- layer 1: quad-merged input (4*cin1 ch), pair-merged output (2*c1 ch)
    KE1 = (2 * 1 + K1 - 1) // 4 + 1         # = 4
    W1Q = jnp.zeros((KE1, 4 * cin1, 2 * c1), jnp.float32)
    for q in range(KE1):
        for r in range(4):
            for p in range(2):
                k = 4 * q + r - 2 * p
                if 0 <= k < K1:
                    W1Q = W1Q.at[q, r * cin1:(r + 1) * cin1,
                                 p * c1:(p + 1) * c1].set(Wf[0][k])
    B1Q = jnp.concatenate([Bf[0], Bf[0]])
    l1p = P - KE1 + 1
    assert l1p == l1 // 2

    # ---- layer 2: pair-merged input (2*c1 ch), normal output (c2 ch)
    KE2 = (K2 - 1) // 2 + 1                 # = 4
    W2Q = jnp.zeros((KE2, 2 * c1, c2), jnp.float32)
    for q in range(KE2):
        for p in range(2):
            k = 2 * q + p
            if k < K2:
                W2Q = W2Q.at[q, p * c1:(p + 1) * c1, :].set(Wf[1][k])
    l2 = l1p - KE2 + 1
    assert l2 == (l1 - K2) // 2 + 1

    l3 = l2 - K3 + 1
    l4 = l3 - K4 + 1
    assert 1 <= l4 and l1p <= P and l2 <= P
    assert max(KE1, KE2, K3, K4, l4) <= PAD_ROWS + 1

    bf = jnp.bfloat16
    f32 = jnp.float32
    ops = [
        W1Q.reshape(KE1 * 4 * cin1, 2 * c1).astype(bf), B1Q.reshape(1, -1).astype(f32),
        W2Q.reshape(KE2 * 2 * c1, c2).astype(bf),       Bf[1].reshape(1, -1).astype(f32),
        Wf[2].reshape(K3 * c2, c3).astype(bf),          Bf[2].reshape(1, -1).astype(f32),
        Wf[3].reshape(K4 * c3, c4).astype(bf),          Bf[3].reshape(1, -1).astype(f32),
        (params['w5'] / float(l4)).astype(bf),          params['b5'].reshape(1, -1).astype(f32),
    ]
    meta = dict(P=P, keffs=(KE1, KE2, K3, K4), l_final=l4, cin_q=4 * cin1)
    return ops, meta


# ------------------------------ fused kernel ---------------------------------

def build_forward(meta, n_classes=10):
    keffs = meta['keffs']
    P = meta['P']
    l_final = meta['l_final']

    def kernel(*refs):
        x_ref = refs[0]
        o_ref = refs[-1]
        op_refs = refs[1:-1]

        Bblk = x_ref.shape[0]
        R = Bblk * P
        # (Bblk, P, 4*C0) -> (Bblk*P, 4*C0): P % 16 == 0, so this is tile-aligned.
        a = x_ref[...].reshape(R, x_ref.shape[2])            # bf16

        idx = 0
        for keff in keffs:
            w_ref = op_refs[idx]
            b_ref = op_refs[idx + 1]
            idx += 2
            cin = a.shape[1]
            apad = jnp.concatenate([a, jnp.zeros((PAD_ROWS, cin), a.dtype)], axis=0)
            # im2col: K shifted copies concatenated along lanes -> ONE 2-D matmul.
            xk = jnp.concatenate([apad[k:k + R, :] for k in range(keff)], axis=1)
            acc = jnp.dot(xk, w_ref[...], preferred_element_type=jnp.float32)
            # bias + ReLU epilogue kept in f32 (v5e-friendly); cast back for next MXU op.
            a = jnp.maximum(acc + b_ref[...], 0.0).astype(jnp.bfloat16)

        # Mean pool (1/L folded into fc5): sum of l_final shifted copies; the
        # correct pooled value for sample b lives at row b*P (rows are selected
        # in XLA by the wrapper).
        w5_ref = op_refs[idx]
        b5_ref = op_refs[idx + 1]
        af = a.astype(jnp.float32)
        apad = jnp.concatenate(
            [af, jnp.zeros((PAD_ROWS, af.shape[1]), jnp.float32)], axis=0)
        pooled = apad[0:R, :]
        for j in range(1, l_final):
            pooled = pooled + apad[j:j + R, :]
        logits = jnp.dot(pooled.astype(jnp.bfloat16), w5_ref[...],
                         preferred_element_type=jnp.float32) + b5_ref[...]
        o_ref[...] = logits[None]                             # (1, Bblk*P, n_classes)

    def forward(x_ncl, ops):
        N, C0, L = x_ncl.shape
        # >= 2 grid steps when possible so v7x megacore can shard the batch axis.
        steps = 1 if N <= 1 else max(2, -(-N // B_MAX))
        Bblk = -(-N // steps)
        n_pad = steps * Bblk

        # NCW -> NLC, then quad-merge 4 consecutive positions into lanes: (N, L/4, 4*C0).
        x_nlc = jnp.transpose(x_ncl, (0, 2, 1)).astype(jnp.bfloat16)
        xq = x_nlc.reshape(N, P, 4 * C0)
        if n_pad != N:
            xq = jnp.concatenate(
                [xq, jnp.zeros((n_pad - N, P, 4 * C0), xq.dtype)], axis=0)

        in_specs = [pl.BlockSpec((Bblk, P, 4 * C0), lambda n: (n, 0, 0))]
        for a in ops:                                         # weights / biases: fetched once
            in_specs.append(pl.BlockSpec(a.shape, lambda n: (0, 0)))

        out = pl.pallas_call(
            kernel,
            out_shape=jax.ShapeDtypeStruct((steps, Bblk * P, n_classes), jnp.float32),
            grid=(steps,),
            in_specs=in_specs,
            out_specs=pl.BlockSpec((1, Bblk * P, n_classes), lambda n: (n, 0, 0)),
            compiler_params=pltpu.CompilerParams(
                dimension_semantics=("parallel",)),           # batch blocks across TCs
        )(xq, *ops)

        # Valid logits sit at row b*P of each step's block; select them in XLA.
        logits = out.reshape(steps, Bblk, P, n_classes)[:, :, 0, :]
        return logits.reshape(n_pad, n_classes)[:N]

    return jax.jit(forward)


# ------------------------ pure-JAX reference check ---------------------------

def ref_forward(x_ncl, params):
    x = x_ncl.astype(jnp.float32)
    for (_cin, _cout, _k, s), layer in zip(_CONV_CFGS, params['convs']):
        y = lax.conv_general_dilated(
            x, layer['w'], window_strides=(s,), padding='VALID',
            dimension_numbers=('NCH', 'OIH', 'NCH'))
        y = (y - layer['mean'][None, :, None]) / jnp.sqrt(layer['var'][None, :, None] + EPS)
        y = y * layer['gamma'][None, :, None] + layer['beta'][None, :, None]
        x = jnp.maximum(y, 0.0)
    pooled = jnp.mean(x, axis=-1)                             # adaptive_avg_pool1d(., 1)
    return pooled @ params['w5'] + params['b5']


if __name__ == "__main__":
    key = jax.random.PRNGKey(0)
    pkey, xkey = jax.random.split(key)
    params = init_params(pkey)

    N, C0, L = 2, 10, 64                                      # conv lengths: 26 -> 10 -> 6 -> 4
    x = jax.random.normal(xkey, (N, C0, L), jnp.float32)

    ops, meta = fold_params(params, L)                        # one-time parameter folding
    fwd = build_forward(meta, n_classes=10)

    out = jax.block_until_ready(fwd(x, ops))
    ref = ref_forward(x, params)

    assert out.shape == (N, 10), out.shape
    err = float(jnp.max(jnp.abs(out - ref)))
    # bf16 MXU operands with f32 accumulation -> loosened tolerance vs f32 reference.
    assert jnp.allclose(out, ref, rtol=5e-2, atol=5e-2), f"max abs err {err}"
    print("KERNEL_OK")
</pallas_src>

<mosaic_0001>
module attributes {stable_mosaic.version = 11 : i64} {
  func.func @kernel(%arg0: i32, %arg1: memref<1x16x40xbf16, #tpu.memory_space<vmem>>, %arg2: memref<160x64xbf16, #tpu.memory_space<vmem>>, %arg3: memref<1x64xf32, #tpu.memory_space<vmem>>, %arg4: memref<256x64xbf16, #tpu.memory_space<vmem>>, %arg5: memref<1x64xf32, #tpu.memory_space<vmem>>, %arg6: memref<320x64xbf16, #tpu.memory_space<vmem>>, %arg7: memref<1x64xf32, #tpu.memory_space<vmem>>, %arg8: memref<192x64xbf16, #tpu.memory_space<vmem>>, %arg9: memref<1x64xf32, #tpu.memory_space<vmem>>, %arg10: memref<64x10xbf16, #tpu.memory_space<vmem>>, %arg11: memref<1x10xf32, #tpu.memory_space<vmem>>, %arg12: memref<1x16x10xf32, #tpu.memory_space<vmem>>) attributes {dimension_semantics = [#tpu.dimension_semantics<parallel>], iteration_bounds = array<i64: 2>, scalar_prefetch = 0 : i64, scratch_operands = 0 : i64, tpu.core_type = #tpu.core_type<tc>, window_params = [{transform_indices = @transform_0, window_bounds = array<i64: 1, 16, 40>}, {pipeline_mode = #tpu.pipeline_mode<synchronous>, transform_indices = @transform_1, window_bounds = array<i64: 160, 64>}, {pipeline_mode = #tpu.pipeline_mode<synchronous>, transform_indices = @transform_2, window_bounds = array<i64: 1, 64>}, {pipeline_mode = #tpu.pipeline_mode<synchronous>, transform_indices = @transform_3, window_bounds = array<i64: 256, 64>}, {pipeline_mode = #tpu.pipeline_mode<synchronous>, transform_indices = @transform_4, window_bounds = array<i64: 1, 64>}, {pipeline_mode = #tpu.pipeline_mode<synchronous>, transform_indices = @transform_5, window_bounds = array<i64: 320, 64>}, {pipeline_mode = #tpu.pipeline_mode<synchronous>, transform_indices = @transform_6, window_bounds = array<i64: 1, 64>}, {pipeline_mode = #tpu.pipeline_mode<synchronous>, transform_indices = @transform_7, window_bounds = array<i64: 192, 64>}, {pipeline_mode = #tpu.pipeline_mode<synchronous>, transform_indices = @transform_8, window_bounds = array<i64: 1, 64>}, {pipeline_mode = #tpu.pipeline_mode<synchronous>, transform_indices = @transform_9, window_bounds = array<i64: 64, 10>}, {pipeline_mode = #tpu.pipeline_mode<synchronous>, transform_indices = @transform_10, window_bounds = array<i64: 1, 10>}, {transform_indices = @transform_11, window_bounds = array<i64: 1, 16, 10>}]} {
    %c0 = arith.constant 0 : index
    %c0_0 = arith.constant 0 : index
    %c0_1 = arith.constant 0 : index
    %0 = vector.load %arg1[%c0, %c0_0, %c0_1] : memref<1x16x40xbf16, #tpu.memory_space<vmem>>, vector<1x16x40xbf16>
    %1 = vector.shape_cast %0 : vector<1x16x40xbf16> to vector<16x40xbf16>
    %cst = arith.constant 0.000000e+00 : bf16
    %2 = vector.broadcast %cst : bf16 to vector<16x40xbf16>
    %3 = tpu.concatenate %1, %2 in 0 : vector<16x40xbf16>, vector<16x40xbf16> -> vector<32x40xbf16>
    %4 = vector.extract_strided_slice %3 {offsets = [0, 0], sizes = [16, 40], strides = [1, 1]} : vector<32x40xbf16> to vector<16x40xbf16>
    %5 = vector.extract_strided_slice %3 {offsets = [1, 0], sizes = [16, 40], strides = [1, 1]} : vector<32x40xbf16> to vector<16x40xbf16>
    %6 = vector.extract_strided_slice %3 {offsets = [2, 0], sizes = [16, 40], strides = [1, 1]} : vector<32x40xbf16> to vector<16x40xbf16>
    %7 = vector.extract_strided_slice %3 {offsets = [3, 0], sizes = [16, 40], strides = [1, 1]} : vector<32x40xbf16> to vector<16x40xbf16>
    %8 = tpu.concatenate %4, %5, %6, %7 in 1 : vector<16x40xbf16>, vector<16x40xbf16>, vector<16x40xbf16>, vector<16x40xbf16> -> vector<16x160xbf16>
    %c0_2 = arith.constant 0 : index
    %c0_3 = arith.constant 0 : index
    %9 = vector.load %arg2[%c0_2, %c0_3] : memref<160x64xbf16, #tpu.memory_space<vmem>>, vector<160x64xbf16>
    %cst_4 = arith.constant dense<0.000000e+00> : vector<16x64xf32>
    %10 = tpu.matmul %8, %9, %cst_4 {dimension_numbers = #tpu.dot_dimension_numbers<[1], [0], [0], [1], [0, 0, 1, 1], [], []>} : vector<16x160xbf16>, vector<160x64xbf16>, vector<16x64xf32> -> vector<16x64xf32>
    %c0_5 = arith.constant 0 : index
    %c0_6 = arith.constant 0 : index
    %11 = vector.load %arg3[%c0_5, %c0_6] : memref<1x64xf32, #tpu.memory_space<vmem>>, vector<1x64xf32>
    %12 = vector.broadcast %11 : vector<1x64xf32> to vector<16x64xf32>
    %13 = arith.addf %10, %12 : vector<16x64xf32>
    %cst_7 = arith.constant 0.000000e+00 : f32
    %14 = vector.broadcast %cst_7 : f32 to vector<16x64xf32>
    %15 = arith.maximumf %13, %14 : vector<16x64xf32>
    %16 = arith.truncf %15 : vector<16x64xf32> to vector<16x64xbf16>
    %cst_8 = arith.constant 0.000000e+00 : bf16
    %17 = vector.broadcast %cst_8 : bf16 to vector<16x64xbf16>
    %18 = tpu.concatenate %16, %17 in 0 : vector<16x64xbf16>, vector<16x64xbf16> -> vector<32x64xbf16>
    %19 = vector.extract_strided_slice %18 {offsets = [0, 0], sizes = [16, 64], strides = [1, 1]} : vector<32x64xbf16> to vector<16x64xbf16>
    %20 = vector.extract_strided_slice %18 {offsets = [1, 0], sizes = [16, 64], strides = [1, 1]} : vector<32x64xbf16> to vector<16x64xbf16>
    %21 = vector.extract_strided_slice %18 {offsets = [2, 0], sizes = [16, 64], strides = [1, 1]} : vector<32x64xbf16> to vector<16x64xbf16>
    %22 = vector.extract_strided_slice %18 {offsets = [3, 0], sizes = [16, 64], strides = [1, 1]} : vector<32x64xbf16> to vector<16x64xbf16>
    %23 = tpu.concatenate %19, %20, %21, %22 in 1 : vector<16x64xbf16>, vector<16x64xbf16>, vector<16x64xbf16>, vector<16x64xbf16> -> vector<16x256xbf16>
    %c0_9 = arith.constant 0 : index
    %c0_10 = arith.constant 0 : index
    %24 = vector.load %arg4[%c0_9, %c0_10] : memref<256x64xbf16, #tpu.memory_space<vmem>>, vector<256x64xbf16>
    %cst_11 = arith.constant dense<0.000000e+00> : vector<16x64xf32>
    %25 = tpu.matmul %23, %24, %cst_11 {dimension_numbers = #tpu.dot_dimension_numbers<[1], [0], [0], [1], [0, 0, 1, 1], [], []>} : vector<16x256xbf16>, vector<256x64xbf16>, vector<16x64xf32> -> vector<16x64xf32>
    %c0_12 = arith.constant 0 : index
    %c0_13 = arith.constant 0 : index
    %26 = vector.load %arg5[%c0_12, %c0_13] : memref<1x64xf32, #tpu.memory_space<vmem>>, vector<1x64xf32>
    %27 = vector.broadcast %26 : vector<1x64xf32> to vector<16x64xf32>
    %28 = arith.addf %25, %27 : vector<16x64xf32>
    %cst_14 = arith.constant 0.000000e+00 : f32
    %29 = vector.broadcast %cst_14 : f32 to vector<16x64xf32>
    %30 = arith.maximumf %28, %29 : vector<16x64xf32>
    %31 = arith.truncf %30 : vector<16x64xf32> to vector<16x64xbf16>
    %cst_15 = arith.constant 0.000000e+00 : bf16
    %32 = vector.broadcast %cst_15 : bf16 to vector<16x64xbf16>
    %33 = tpu.concatenate %31, %32 in 0 : vector<16x64xbf16>, vector<16x64xbf16> -> vector<32x64xbf16>
    %34 = vector.extract_strided_slice %33 {offsets = [0, 0], sizes = [16, 64], strides = [1, 1]} : vector<32x64xbf16> to vector<16x64xbf16>
    %35 = vector.extract_strided_slice %33 {offsets = [1, 0], sizes = [16, 64], strides = [1, 1]} : vector<32x64xbf16> to vector<16x64xbf16>
    %36 = vector.extract_strided_slice %33 {offsets = [2, 0], sizes = [16, 64], strides = [1, 1]} : vector<32x64xbf16> to vector<16x64xbf16>
    %37 = vector.extract_strided_slice %33 {offsets = [3, 0], sizes = [16, 64], strides = [1, 1]} : vector<32x64xbf16> to vector<16x64xbf16>
    %38 = vector.extract_strided_slice %33 {offsets = [4, 0], sizes = [16, 64], strides = [1, 1]} : vector<32x64xbf16> to vector<16x64xbf16>
    %39 = tpu.concatenate %34, %35, %36, %37, %38 in 1 : vector<16x64xbf16>, vector<16x64xbf16>, vector<16x64xbf16>, vector<16x64xbf16>, vector<16x64xbf16> -> vector<16x320xbf16>
    %c0_16 = arith.constant 0 : index
    %c0_17 = arith.constant 0 : index
    %40 = vector.load %arg6[%c0_16, %c0_17] : memref<320x64xbf16, #tpu.memory_space<vmem>>, vector<320x64xbf16>
    %cst_18 = arith.constant dense<0.000000e+00> : vector<16x64xf32>
    %41 = tpu.matmul %39, %40, %cst_18 {dimension_numbers = #tpu.dot_dimension_numbers<[1], [0], [0], [1], [0, 0, 1, 1], [], []>} : vector<16x320xbf16>, vector<320x64xbf16>, vector<16x64xf32> -> vector<16x64xf32>
    %c0_19 = arith.constant 0 : index
    %c0_20 = arith.constant 0 : index
    %42 = vector.load %arg7[%c0_19, %c0_20] : memref<1x64xf32, #tpu.memory_space<vmem>>, vector<1x64xf32>
    %43 = vector.broadcast %42 : vector<1x64xf32> to vector<16x64xf32>
    %44 = arith.addf %41, %43 : vector<16x64xf32>
    %cst_21 = arith.constant 0.000000e+00 : f32
    %45 = vector.broadcast %cst_21 : f32 to vector<16x64xf32>
    %46 = arith.maximumf %44, %45 : vector<16x64xf32>
    %47 = arith.truncf %46 : vector<16x64xf32> to vector<16x64xbf16>
    %cst_22 = arith.constant 0.000000e+00 : bf16
    %48 = vector.broadcast %cst_22 : bf16 to vector<16x64xbf16>
    %49 = tpu.concatenate %47, %48 in 0 : vector<16x64xbf16>, vector<16x64xbf16> -> vector<32x64xbf16>
    %50 = vector.extract_strided_slice %49 {offsets = [0, 0], sizes = [16, 64], strides = [1, 1]} : vector<32x64xbf16> to vector<16x64xbf16>
    %51 = vector.extract_strided_slice %49 {offsets = [1, 0], sizes = [16, 64], strides = [1, 1]} : vector<32x64xbf16> to vector<16x64xbf16>
    %52 = vector.extract_strided_slice %49 {offsets = [2, 0], sizes = [16, 64], strides = [1, 1]} : vector<32x64xbf16> to vector<16x64xbf16>
    %53 = tpu.concatenate %50, %51, %52 in 1 : vector<16x64xbf16>, vector<16x64xbf16>, vector<16x64xbf16> -> vector<16x192xbf16>
    %c0_23 = arith.constant 0 : index
    %c0_24 = arith.constant 0 : index
    %54 = vector.load %arg8[%c0_23, %c0_24] : memref<192x64xbf16, #tpu.memory_space<vmem>>, vector<192x64xbf16>
    %cst_25 = arith.constant dense<0.000000e+00> : vector<16x64xf32>
    %55 = tpu.matmul %53, %54, %cst_25 {dimension_numbers = #tpu.dot_dimension_numbers<[1], [0], [0], [1], [0, 0, 1, 1], [], []>} : vector<16x192xbf16>, vector<192x64xbf16>, vector<16x64xf32> -> vector<16x64xf32>
    %c0_26 = arith.constant 0 : index
    %c0_27 = arith.constant 0 : index
    %56 = vector.load %arg9[%c0_26, %c0_27] : memref<1x64xf32, #tpu.memory_space<vmem>>, vector<1x64xf32>
    %57 = vector.broadcast %56 : vector<1x64xf32> to vector<16x64xf32>
    %58 = arith.addf %55, %57 : vector<16x64xf32>
    %cst_28 = arith.constant 0.000000e+00 : f32
    %59 = vector.broadcast %cst_28 : f32 to vector<16x64xf32>
    %60 = arith.maximumf %58, %59 : vector<16x64xf32>
    %61 = arith.truncf %60 : vector<16x64xf32> to vector<16x64xbf16>
    %62 = arith.extf %61 : vector<16x64xbf16> to vector<16x64xf32>
    %cst_29 = arith.constant 0.000000e+00 : f32
    %63 = vector.broadcast %cst_29 : f32 to vector<16x64xf32>
    %64 = tpu.concatenate %62, %63 in 0 : vector<16x64xf32>, vector<16x64xf32> -> vector<32x64xf32>
    %65 = vector.extract_strided_slice %64 {offsets = [0, 0], sizes = [16, 64], strides = [1, 1]} : vector<32x64xf32> to vector<16x64xf32>
    %66 = vector.extract_strided_slice %64 {offsets = [1, 0], sizes = [16, 64], strides = [1, 1]} : vector<32x64xf32> to vector<16x64xf32>
    %67 = arith.addf %65, %66 : vector<16x64xf32>
    %68 = vector.extract_strided_slice %64 {offsets = [2, 0], sizes = [16, 64], strides = [1, 1]} : vector<32x64xf32> to vector<16x64xf32>
    %69 = arith.addf %67, %68 : vector<16x64xf32>
    %70 = vector.extract_strided_slice %64 {offsets = [3, 0], sizes = [16, 64], strides = [1, 1]} : vector<32x64xf32> to vector<16x64xf32>
    %71 = arith.addf %69, %70 : vector<16x64xf32>
    %72 = arith.truncf %71 : vector<16x64xf32> to vector<16x64xbf16>
    %c0_30 = arith.constant 0 : index
    %c0_31 = arith.constant 0 : index
    %73 = vector.load %arg10[%c0_30, %c0_31] : memref<64x10xbf16, #tpu.memory_space<vmem>>, vector<64x10xbf16>
    %cst_32 = arith.constant dense<0.000000e+00> : vector<16x10xf32>
    %74 = tpu.matmul %72, %73, %cst_32 {dimension_numbers = #tpu.dot_dimension_numbers<[1], [0], [0], [1], [0, 0, 1, 1], [], []>} : vector<16x64xbf16>, vector<64x10xbf16>, vector<16x10xf32> -> vector<16x10xf32>
    %c0_33 = arith.constant 0 : index
    %c0_34 = arith.constant 0 : index
    %75 = vector.load %arg11[%c0_33, %c0_34] : memref<1x10xf32, #tpu.memory_space<vmem>>, vector<1x10xf32>
    %76 = vector.broadcast %75 : vector<1x10xf32> to vector<16x10xf32>
    %77 = arith.addf %74, %76 : vector<16x10xf32>
    %78 = vector.shape_cast %77 : vector<16x10xf32> to vector<1x16x10xf32>
    %c0_35 = arith.constant 0 : index
    %c0_36 = arith.constant 0 : index
    %c0_37 = arith.constant 0 : index
    %79 = vector.load %arg12[%c0_35, %c0_36, %c0_37] : memref<1x16x10xf32, #tpu.memory_space<vmem>>, vector<1x16x10xf32>
    tpu.vector_store %arg12[%c0_35, %c0_36, %c0_37], %78 {strides = array<i32>} : memref<1x16x10xf32, #tpu.memory_space<vmem>>, vector<1x16x10xf32>,
    return
  }
  func.func @transform_0(%arg0: i32) -> (i32, i32, i32) {
    %c0_i32 = arith.constant 0 : i32
    %c0_i32_0 = arith.constant 0 : i32
    %c0_i32_1 = arith.constant 0 : i32
    return %arg0, %c0_i32, %c0_i32_0 : i32, i32, i32
  }
  func.func @transform_1(%arg0: i32) -> (i32, i32) {
    %c0_i32 = arith.constant 0 : i32
    %c0_i32_0 = arith.constant 0 : i32
    %c0_i32_1 = arith.constant 0 : i32
    return %c0_i32, %c0_i32_0 : i32, i32
  }
  func.func @transform_2(%arg0: i32) -> (i32, i32) {
    %c0_i32 = arith.constant 0 : i32
    %c0_i32_0 = arith.constant 0 : i32
    %c0_i32_1 = arith.constant 0 : i32
    return %c0_i32, %c0_i32_0 : i32, i32
  }
  func.func @transform_3(%arg0: i32) -> (i32, i32) {
    %c0_i32 = arith.constant 0 : i32
    %c0_i32_0 = arith.constant 0 : i32
    %c0_i32_1 = arith.constant 0 : i32
    return %c0_i32, %c0_i32_0 : i32, i32
  }
  func.func @transform_4(%arg0: i32) -> (i32, i32) {
    %c0_i32 = arith.constant 0 : i32
    %c0_i32_0 = arith.constant 0 : i32
    %c0_i32_1 = arith.constant 0 : i32
    return %c0_i32, %c0_i32_0 : i32, i32
  }
  func.func @transform_5(%arg0: i32) -> (i32, i32) {
    %c0_i32 = arith.constant 0 : i32
    %c0_i32_0 = arith.constant 0 : i32
    %c0_i32_1 = arith.constant 0 : i32
    return %c0_i32, %c0_i32_0 : i32, i32
  }
  func.func @transform_6(%arg0: i32) -> (i32, i32) {
    %c0_i32 = arith.constant 0 : i32
    %c0_i32_0 = arith.constant 0 : i32
    %c0_i32_1 = arith.constant 0 : i32
    return %c0_i32, %c0_i32_0 : i32, i32
  }
  func.func @transform_7(%arg0: i32) -> (i32, i32) {
    %c0_i32 = arith.constant 0 : i32
    %c0_i32_0 = arith.constant 0 : i32
    %c0_i32_1 = arith.constant 0 : i32
    return %c0_i32, %c0_i32_0 : i32, i32
  }
  func.func @transform_8(%arg0: i32) -> (i32, i32) {
    %c0_i32 = arith.constant 0 : i32
    %c0_i32_0 = arith.constant 0 : i32
    %c0_i32_1 = arith.constant 0 : i32
    return %c0_i32, %c0_i32_0 : i32, i32
  }
  func.func @transform_9(%arg0: i32) -> (i32, i32) {
    %c0_i32 = arith.constant 0 : i32
    %c0_i32_0 = arith.constant 0 : i32
    %c0_i32_1 = arith.constant 0 : i32
    return %c0_i32, %c0_i32_0 : i32, i32
  }
  func.func @transform_10(%arg0: i32) -> (i32, i32) {
    %c0_i32 = arith.constant 0 : i32
    %c0_i32_0 = arith.constant 0 : i32
    %c0_i32_1 = arith.constant 0 : i32
    return %c0_i32, %c0_i32_0 : i32, i32
  }
  func.func @transform_11(%arg0: i32) -> (i32, i32, i32) {
    %c0_i32 = arith.constant 0 : i32
    %c0_i32_0 = arith.constant 0 : i32
    %c0_i32_1 = arith.constant 0 : i32
    return %arg0, %c0_i32, %c0_i32_0 : i32, i32, i32
  }
}

</mosaic_0001>

<bundles_post_ra>
// kernel: forward.1
= control target key start
LH: loop header
LB: loop body
LE: loop exit
PB: predicated region body
PF: predicated region fallthrough
CT: control target
= control target key end

     0   :  { %s1723_s17 = smov 0   ;;  %s2031_s0 = inlined_call_operand.vmem [shape: bf16[2,16,40], index: 0, kind: input, shape index: {}]   ;;  %s2032_s1 = inlined_call_operand.vmem [shape: bf16[160,64], index: 1, kind: input, shape index: {}]   ;;  %s2033_s2 = inlined_call_operand.vmem [shape: f32[1,64], index: 2, kind: input, shape index: {}]   ;;  %s2034_s3 = inlined_call_operand.vmem [shape: bf16[256,64], index: 3, kind: input, shape index: {}]   ;;  %s2035_s4 = inlined_call_operand.vmem [shape: f32[1,64], index: 4, kind: input, shape index: {}]   ;;  %s2036_s5 = inlined_call_operand.vmem [shape: bf16[320,64], index: 5, kind: input, shape index: {}]   ;;  %s2037_s6 = inlined_call_operand.vmem [shape: f32[1,64], index: 6, kind: input, shape index: {}]   ;;  %s2038_s7 = inlined_call_operand.vmem [shape: bf16[192,64], index: 7, kind: input, shape index: {}]   ;;  %s2039_s8 = inlined_call_operand.vmem [shape: f32[1,64], index: 8, kind: input, shape index: {}]   ;;  %s2040_s9 = inlined_call_operand.vmem [shape: bf16[64,10], index: 9, kind: input, shape index: {}]   ;;  %s2041_s10 = inlined_call_operand.vmem [shape: f32[1,10], index: 10, kind: input, shape index: {}]   ;;  %s2042_s11 = inlined_call_operand.vmem [shape: f32[2,16,10], index: 11, kind: output, shape index: {}]  }
   0x1 LB: > { %s1407_s18 = sadd.s32 4294967295, %s1654_s17   ;;  %p1411_p0 = scmp.ge.s32.totalorder %s1654_s17, 1  ;;  %s1654_s17 = sphi %s1723_s17, %s21_s17  }
   0x2   : > { %p337_p1 = scmp.lt.s32.totalorder %s1654_s17, 3 }
   0x4   : > { %p338_p2 = pnand %p1411_p0, %p337_p1 }
   0x5   : > { %p377_p3 = scmp.lt.s32.totalorder (!%p338_p2), %s1407_s18, 1  ;;  %s1657_s14 = smov (!%p338_p2), 40  }
   0x6   : > { %341 = sbr.rel (%p338_p2) target bundleno = 1559 (0x617), region = 64  ;;  %s1658_s15 = smov (!%p338_p2), 120  }
   0x7   : > { %s1659_s20 = smov (!%p338_p2), 80   ;;  %s1660_s29 = smov (!%p338_p2), 64  }
   0xb   : > { %v1656_v0 = vmov 0   ;;  %s2044_s18 = smov (!%p377_p3, %s1407_s18), 1  ;;  %v1586_v1 = vld [vmem:[%s2032_s1 + $0x38] sm:$0xff]   ;;  %v1587_v2 = vld [vmem:[%s2032_s1 + $0x30] sm:$0xff]   ;;  %vm395_vm0 = vsmask.f32 7424 }
   0xc   : > { %529 = vmatprep.subr.bf16.mxu0 %v1656_v0  ;;  %s1490_s21 = sshll.u32 %s2044_s18, 3  ;;  %v1746_v4 = vrot.slane %v1656_v0, 2  ;;  %vm417_vm1 = vsmask.f32 6400  ;;  %v1749_v7 = vrot.slane %v1656_v0, 1  ;;  %v1588_v8 = vld [vmem:[%s2032_s1 + $0x28] sm:$0xff]  }
   0xd   : > { %530 = vmatpush1.bf16.msra.mxu0 %v1586_v1  ;;  %s381_s26 = scalar_lea.vmem %s2031_s0, %s1490_s21  ;;  %v1589_v16 = vld [vmem:[%s2032_s1 + $0x20] sm:$0xff]   ;;  %vm411_vm2 = vcmask 1046528   ;;  %v1590_v19 = vld [vmem:[%s2032_s1 + $0x18] sm:$0xff]   ;;  %v1591_v21 = vld [vmem:[%s2032_s1 + $0x10] sm:$0xff]   ;;  %vm526_vm3 = vcmask 261120   ;;  %vm429_vm4 = vcmask 326656  }
   0xe   : > { %531 = vmatprep.subr.bf16.mxu0 %v1656_v0  ;;  %v1585_v3 = vld [vmem:[%s381_s26] sm:$0xff]   ;;  %v1757_v12 = vor.u32 %v1746_v4, %v1749_v7  ;;  %v1592_v22 = vld [vmem:[%s2032_s1 + $0x8] sm:$0xff]   ;;  %vm432_vm5 = vcmask 654336   ;;  %vm435_vm6 = vcmask 982016   ;;  %v1596_v32 = vld [vmem:[%s2034_s3 + $0x78] sm:$0xff]   ;;  %vm592_vm7 = vcmask 523264  }
   0xf   : > { %v397_v5 = vshrl.u32 %v1585_v3, 16  ;;  %v399_v6 = vshll.u32 %v1585_v3, 16  ;;  %v412_v14 = vrot.slane %v1585_v3, 1  ;;  %v1593_v23 = vld [vmem:[%s2032_s1] sm:$0xff]   ;;  %v1594_v24 = vld [vmem:[%s2032_s1 + $0x48] sm:$0xff]   ;;  %v1597_v33 = vld [vmem:[%s2034_s3 + $0x38] sm:$0xff]   ;;  %1492 = vmatprep.subr.bf16.mxu1 %v1596_v32 }
  0x10   : > { %v1595_v25 = vld [vmem:[%s2032_s1 + $0x40] sm:$0xff]   ;;  %v1598_v34 = vld [vmem:[%s2034_s3 + $0x70] sm:$0xff]   ;;  %1493 = vmatpush3.bf16.msra.mxu1 %v1597_v33  ;;  %v1600_v36 = vld [vmem:[%s2034_s3 + $0x68] sm:$0xff]   ;;  %vm1662_vm8 = vmmov 0   ;;  %vm798_vm9 = vcmask 1045504   ;;  %vm1255_vm10 = vcmask 1044480  }
  0x11   : > { %532 = vmatpush1.bf16.msra.mxu0 %v1587_v2  ;;  %v401_v9 = vrot.slane %v399_v6, 1  ;;  %v418_v10 = vrot.slane %v397_v5, 1  ;;  %v419_v11 = vrot.slane %v399_v6, 2  ;;  %v414_v20 = vsel %vm411_vm2, %v412_v14, %v1749_v7  ;;  %v1599_v35 = vld [vmem:[%s2034_s3 + $0x30] sm:$0xff]   ;;  %1494 = vmatprep.subr.bf16.mxu1 %v1598_v34  ;;  %v1601_v37 = vld [vmem:[%s2034_s3 + $0x28] sm:$0xff]   ;;  %v1602_v38 = vld [vmem:[%s2034_s3 + $0x60] sm:$0xff]  }
  0x12   : > { %533 = vmatprep.subr.bf16.mxu0 %v1656_v0  ;;  %v1603_v39 = vld [vmem:[%s2034_s3 + $0x20] sm:$0xff]   ;;  %v1604_v40 = vld [vmem:[%s2034_s3 + $0x58] sm:$0xff]   ;;  %v1606_v42 = vld [vmem:[%s2034_s3 + $0x50] sm:$0xff]   ;;  %s1491_s26 = sshll.u32 %s2044_s18, 4  ;;  %vm1349_vm11 = vcmask 80896  }
  0x13   : > { %v402_v13 = vor.u32 %v401_v9, %v397_v5  ;;  %v420_v15 = vor.u32 %v419_v11, %v418_v10  ;;  %v1605_v41 = vld [vmem:[%s2034_s3 + $0x18] sm:$0xff]   ;;  %v1607_v43 = vld [vmem:[%s2034_s3 + $0x10] sm:$0xff]   ;;  %v1608_v44 = vld [vmem:[%s2034_s3 + $0x48] sm:$0xff]   ;;  %s386_s13 = scalar_lea.vmem %s2042_s11, %s1491_s26 }
  0x14   : > { %1495 = vmatpush3.bf16.msra.mxu1 %v1599_v35  ;;  %v1609_v45 = vld [vmem:[%s2034_s3 + $0x8] sm:$0xff]   ;;  %v1610_v46 = vld [vmem:[%s2034_s3 + $0x40] sm:$0xff]   ;;  %v1613_v14 = vld [vmem:[%s2036_s5 + $0x38] sm:$0xff]  }
  0x15   : > { %534 = vmatpush1.bf16.msra.mxu0 %v1588_v8  ;;  %v407_v17 = vsel %vm395_vm0, %v402_v13, %v1749_v7  ;;  %v426_v18 = vsel %vm417_vm1, %v420_v15, %v1757_v12  ;;  %1496 = vmatprep.subr.bf16.mxu1 %v1600_v36  ;;  %v1611_v47 = vld [vmem:[%s2034_s3] sm:$0xff]   ;;  %v1612_v13 = vld [vmem:[%s2036_s5 + $0x78] sm:$0xff]   ;;  %v1614_v15 = vld [vmem:[%s2036_s5 + $0x70] sm:$0xff]  }
  0x16   : > { %535 = vmatprep.subr.bf16.mxu0 %v1656_v0  ;;  %408 = vrot.lane.b32.xlu0 %v407_v17, %s1657_s14  ;;  %v1417_v48 = vld [vmem:[%s2033_s2] ss:$0 sm:$0xff]  ;;  %v1616_v17 = vld [vmem:[%s2036_s5 + $0x68] sm:$0xff]  }
  0x17   : > { %427 = vrot.lane.b32.xlu1 %v426_v18, %s1658_s15  ;;  %v1617_v18 = vld [vmem:[%s2036_s5 + $0x28] sm:$0xff]   ;;  %v1429_v32 = vld [vmem:[%s2035_s4] ss:$0 sm:$0xff] }
  0x18   : > { %1497 = vmatpush3.bf16.msra.mxu1 %v1601_v37 }
  0x19   : > { %536 = vmatpush1.bf16.msra.mxu0 %v1589_v16  ;;  %1498 = vmatprep.subr.bf16.mxu1 %v1602_v38  ;;  %v1615_v16 = vld [vmem:[%s2036_s5 + $0x30] sm:$0xff]   ;;  %v1661_v38 = vmov 0.0  }
  0x1a   : > { %537 = vmatprep.subr.bf16.mxu0 %v1656_v0  ;;  %415 = vrot.lane.b32.xlu0 %v414_v20, %s1659_s20  ;;  %v1619_v20 = vld [vmem:[%s2036_s5 + $0x20] sm:$0xff]  }
  0x1c   : > { %1499 = vmatpush3.bf16.msra.mxu1 %v1603_v39 }
  0x1d   : > { %538 = vmatpush1.bf16.msra.mxu0 %v1590_v19  ;;  %1500 = vmatprep.subr.bf16.mxu1 %v1604_v40  ;;  %v1618_v19 = vld [vmem:[%s2036_s5 + $0x60] sm:$0xff]  }
  0x1e   : > { %539 = vmatprep.subr.bf16.mxu0 %v1656_v0 }
  0x20   : > { %1501 = vmatpush3.bf16.msra.mxu1 %v1605_v41 }
  0x21   : > { %540 = vmatpush1.bf16.msra.mxu0 %v1591_v21  ;;  %1502 = vmatprep.subr.bf16.mxu1 %v1606_v42  ;;  %v1620_v21 = vld [vmem:[%s2036_s5 + $0x58] sm:$0xff]  }
  0x22   : > { %541 = vmatprep.subr.bf16.mxu0 %v1656_v0 }
  0x24   : > { %1503 = vmatpush3.bf16.msra.mxu1 %v1607_v43 }
  0x25   : > { %542 = vmatpush1.bf16.msra.mxu0 %v1592_v22  ;;  %1504 = vmatprep.subr.bf16.mxu1 %v1608_v44  ;;  %v1621_v22 = vld [vmem:[%s2036_s5 + $0x18] sm:$0xff]  }
  0x26   : > { %543 = vmatprep.subr.bf16.mxu0 %v1656_v0 }
  0x28   : > { %1505 = vmatpush3.bf16.msra.mxu1 %v1609_v45 }
  0x29   : > { %544 = vmatpush1.bf16.msra.mxu0 %v1593_v23  ;;  %1506 = vmatprep.subr.bf16.mxu1 %v1610_v46  ;;  %v1622_v23 = vld [vmem:[%s2036_s5 + $0x50] sm:$0xff]  }
  0x2a   : > { %557 = vmatprep.subr.bf16.mxu0 %v1656_v0 }
  0x2c   : > { %1507 = vmatpush3.bf16.msra.mxu1 %v1611_v47 }
  0x2d   : > { %558 = vmatpush2.bf16.msra.mxu0 %v1594_v24  ;;  %1514 = vmatprep.subr.bf16.mxu1 %v1612_v13  ;;  %v1623_v24 = vld [vmem:[%s2036_s5 + $0x10] sm:$0xff]  }
  0x2e   : > { %559 = vmatprep.subr.bf16.mxu0 %v1656_v0 }
  0x31   : > { %560 = vmatpush2.bf16.msra.mxu0 %v1595_v25  ;;  %v1624_v25 = vld [vmem:[%s2036_s5 + $0x48] sm:$0xff]  }
  0x32   : > { %1186 = vmatprep.subr.bf16.mxu0 %v1656_v0 }
  0x88   : > { %v409_v26 = vpop.permute.xlu0 %408 }
  0x89   : > { %v428_v27 = vpop.permute.xlu1 %427  ;;  %v431_v28 = vsel %vm429_vm4, %v1585_v3, %v409_v26  ;;  %v1625_v26 = vld [vmem:[%s2036_s5 + $0x8] sm:$0xff]  }
  0x8a   : > { %1428 = vmatprep.mubr.msk.bf16.mxu0 %vm526_vm3, %v428_v27 }
  0x8c   : > { %v416_v29 = vpop.permute.xlu0 %415 }
  0x8d   : > { %v434_v30 = vsel %vm432_vm5, %v431_v28, %v416_v29  ;;  %v1627_v28 = vld [vmem:[%s2036_s5] sm:$0xff]  }
  0x8e   : > { %v437_v31 = vsel %vm435_vm6, %v434_v30, %v428_v27  ;;  %v1626_v27 = vld [vmem:[%s2036_s5 + $0x40] sm:$0xff]  }
  0x8f   : > { %562 = vmatmul.mubr.bf16.vlgmr.msra.gmra.mxu0 %v437_v31 }
 0x14f   : > { %v563_v49 = vpop.f32.mrf.mxu0 }
 0x150   : > { %v564_v51 = vadd.f32 %v1417_v48, %v563_v49 }
 0x151   : > { %v565_v50 = vpop.f32.mrf.mxu0 }
 0x152   : > { %v570_v55 = vmax.f32 %v564_v51, 0.0 }
 0x153   : > { %v566_v52 = vpop.f32.mrf.mxu0 }
 0x154   : > { %v567_v53 = vadd.f32 %v1417_v48, %v566_v52 }
 0x155   : > { %v568_v54 = vpop.f32.mrf.mxu0 }
 0x156   : > { %v571_v56 = vmax.f32 %v567_v53, 0.0 }
 0x158   : > { %v572_v57 = vpack.c.bf16 %v571_v56, %v570_v55  ;;  %v1628_v55 = vld [vmem:[%s2036_s5 + $0x98] sm:$0xff]  }
 0x15a   : > { %v574_v58 = vshrl.u32 %v572_v57, 16  ;;  %v576_v59 = vshll.u32 %v572_v57, 16  ;;  %v584_v5 = vrot.slane %v572_v57, 1 }
 0x15c   : > { %v586_v60 = vrot.slane %v574_v58, 1  ;;  %v587_v61 = vrot.slane %v576_v59, 2  ;;  %v578_v62 = vrot.slane %v576_v59, 1  ;;  %v585_v9 = vsel %vm411_vm2, %v584_v5, %v1749_v7  ;;  %v1631_v59 = vld [vmem:[%s2036_s5 + $0x80] sm:$0xff]   ;;  %v1638_v5 = vld [vmem:[%s2038_s7 + $0x8] sm:$0xff]  }
 0x15e   : > { %v588_v63 = vor.u32 %v587_v61, %v586_v60  ;;  %v579_v1 = vor.u32 %v578_v62, %v574_v58  ;;  %v1630_v58 = vld [vmem:[%s2036_s5 + $0x88] sm:$0xff]   ;;  %v1632_v62 = vld [vmem:[%s2038_s7 + $0x38] sm:$0xff]  }
 0x15f   : > { %1187 = vmatpush1.bf16.msra.mxu0 %v1632_v62 }
 0x160   : > { %v589_v2 = vsel %vm417_vm1, %v588_v63, %v1757_v12  ;;  %v580_v3 = vsel %vm395_vm0, %v579_v1, %v1749_v7  ;;  %v1633_v63 = vld [vmem:[%s2038_s7 + $0x30] sm:$0xff]   ;;  %1188 = vmatprep.subr.bf16.mxu0 %v1656_v0  ;;  %v1635_v1 = vld [vmem:[%s2038_s7 + $0x20] sm:$0xff]  }
 0x161   : > { %590 = vrot.lane.b32.xlu1 %v589_v2, %s1660_s29  ;;  %581 = vrot.lane.b32.xlu0 %v580_v3, %s1660_s29  ;;  %v1636_v2 = vld [vmem:[%s2038_s7 + $0x18] sm:$0xff]   ;;  %v1637_v3 = vld [vmem:[%s2038_s7 + $0x10] sm:$0xff]  }
 0x163   : > { %1189 = vmatpush1.bf16.msra.mxu0 %v1633_v63 }
 0x164   : > { %1190 = vmatprep.subr.bf16.mxu0 %v1656_v0 }
 0x1d3   : > { %v591_v6 = vpop.permute.xlu1 %590  ;;  %v582_v8 = vpop.permute.xlu0 %581 }
 0x1d4   : > { %v598_v10 = vsel %vm592_vm7, %v585_v9, %v591_v6  ;;  %v594_v11 = vsel %vm592_vm7, %v572_v57, %v582_v8  ;;  %v1629_v57 = vld [vmem:[%s2036_s5 + $0x90] sm:$0xff]   ;;  %v1639_v6 = vld [vmem:[%s2038_s7] sm:$0xff]   ;;  %v1640_v8 = vld [vmem:[%s2038_s7 + $0x58] sm:$0xff]  }
 0x1d5   : > { %767 = vmatprep.mubr.bf16.mxu1 %v598_v10  ;;  %v1641_v9 = vld [vmem:[%s2038_s7 + $0x50] sm:$0xff]   ;;  %v1642_v10 = vld [vmem:[%s2038_s7 + $0x48] sm:$0xff]  }
 0x1d6   : > { %768 = vmatmul.mubr.bf16.vlgmr.msra.gmra.mxu1 %v594_v11  ;;  %v1643_v11 = vld [vmem:[%s2038_s7 + $0x40] sm:$0xff]  }
 0x1d7   : > { %1515 = vmatpush3.bf16.msra.mxu1 %v1613_v14 }
 0x1d8   : > { %1516 = vmatprep.subr.bf16.mxu1 %v1614_v15 }
 0x1db   : > { %1517 = vmatpush3.bf16.msra.mxu1 %v1615_v16 }
 0x1dc   : > { %1518 = vmatprep.subr.bf16.mxu1 %v1616_v17 }
 0x1df   : > { %1519 = vmatpush3.bf16.msra.mxu1 %v1617_v18  ;;  %v1446_v18 = vld [vmem:[%s2037_s6] ss:$0 sm:$0xff] }
 0x1e0   : > { %1520 = vmatprep.subr.bf16.mxu1 %v1618_v19 }
 0x1e3   : > { %1521 = vmatpush3.bf16.msra.mxu1 %v1619_v20 }
 0x1e4   : > { %1522 = vmatprep.subr.bf16.mxu1 %v1620_v21 }
 0x1e7   : > { %1523 = vmatpush3.bf16.msra.mxu1 %v1621_v22 }
 0x1e8   : > { %1524 = vmatprep.subr.bf16.mxu1 %v1622_v23 }
 0x1eb   : > { %1525 = vmatpush3.bf16.msra.mxu1 %v1623_v24 }
 0x1ec   : > { %1526 = vmatprep.subr.bf16.mxu1 %v1624_v25 }
 0x1ef   : > { %1527 = vmatpush3.bf16.msra.mxu1 %v1625_v26 }
 0x1f0   : > { %1528 = vmatprep.subr.bf16.mxu1 %v1626_v27 }
 0x1f3   : > { %1529 = vmatpush3.bf16.msra.mxu1 %v1627_v28 }
 0x1f4   : > { %1546 = vmatprep.subr.bf16.mxu1 %v1661_v38 }
 0x296   : > { %v1508_v29 = vpop.f32.mrf.mxu1 }
 0x298   : > { %v1509_v30 = vpop.f32.mrf.mxu1 }
 0x299   : > { %v1510_v31 = vadd.f32 %v1509_v30, %v1508_v29 }
 0x29a   : > { %v1511_v33 = vpop.f32.mrf.mxu1 }
 0x29b   : > { %v770_v35 = vadd.f32 %v1510_v31, %v1429_v32 }
 0x29c   : > { %v1512_v34 = vpop.f32.mrf.mxu1 }
 0x29d   : > { %v1513_v36 = vadd.f32 %v1512_v34, %v1511_v33  ;;  %v776_v39 = vmax.f32 %v770_v35, 0.0 }
 0x29f   : > { %v773_v37 = vadd.f32 %v1513_v36, %v1429_v32 }
 0x2a1   : > { %v777_v40 = vmax.f32 %v773_v37, 0.0 }
 0x2a3   : > { %v778_v41 = vpack.c.bf16 %v777_v40, %v776_v39  ;;  %v1644_v40 = vld [vmem:[%s2040_s9 + $0x18] sm:$0xff]  }
 0x2a5   : > { %v780_v42 = vshrl.u32 %v778_v41, 16  ;;  %v782_v43 = vshll.u32 %v778_v41, 16  ;;  %v790_v51 = vrot.slane %v778_v41, 1  ;;  %v799_v60 = vrot.slane %v778_v41, 2 }
 0x2a7   : > { %v792_v44 = vrot.slane %v780_v42, 1  ;;  %v793_v45 = vrot.slane %v782_v43, 2  ;;  %v784_v46 = vrot.slane %v782_v43, 1  ;;  %v791_v54 = vsel %vm411_vm2, %v790_v51, %v1749_v7  ;;  %v1468_v43 = vld [vmem:[%s2039_s8] ss:$0 sm:$0xff] }
 0x2a8   : > { %v801_v61 = vsel %vm798_vm9, %v799_v60, %v1746_v4  ;;  %v1634_v4 = vld [vmem:[%s2038_s7 + $0x28] sm:$0xff]   ;;  %v1259_v60 = vrot.slane %v1661_v38, 3 }
 0x2a9   : > { %v794_v47 = vor.u32 %v793_v45, %v792_v44  ;;  %v785_v48 = vor.u32 %v784_v46, %v780_v42  ;;  %1191 = vmatpush1.bf16.msra.mxu0 %v1634_v4  ;;  %v1647_v42 = vld [vmem:[%s2040_s9] sm:$0xff]  }
 0x2aa   : > { %1192 = vmatprep.subr.bf16.mxu0 %v1656_v0 }
 0x2ab   : > { %v795_v49 = vsel %vm417_vm1, %v794_v47, %v1757_v12  ;;  %v786_v50 = vsel %vm395_vm0, %v785_v48, %v1749_v7 }
 0x2ac   : > { %796 = vrot.lane.b32.xlu1 %v795_v49, %s1660_s29  ;;  %787 = vrot.lane.b32.xlu0 %v786_v50, %s1660_s29 }
 0x2ad   : > { %1193 = vmatpush1.bf16.msra.mxu0 %v1635_v1 }
 0x2ae   : > { %1194 = vmatprep.subr.bf16.mxu0 %v1656_v0 }
 0x2b1   : > { %1195 = vmatpush1.bf16.msra.mxu0 %v1636_v2 }
 0x2b2   : > { %1196 = vmatprep.subr.bf16.mxu0 %v1656_v0 }
 0x2b5   : > { %1197 = vmatpush1.bf16.msra.mxu0 %v1637_v3 }
 0x2b6   : > { %1198 = vmatprep.subr.bf16.mxu0 %v1656_v0 }
 0x2b9   : > { %1199 = vmatpush1.bf16.msra.mxu0 %v1638_v5 }
 0x2ba   : > { %1200 = vmatprep.subr.bf16.mxu0 %v1656_v0 }
 0x2bd   : > { %1201 = vmatpush1.bf16.msra.mxu0 %v1639_v6 }
 0x2be   : > { %1210 = vmatprep.subr.bf16.mxu0 %v1656_v0 }
 0x2c1   : > { %1211 = vmatpush2.bf16.msra.mxu0 %v1640_v8 }
 0x2c2   : > { %1212 = vmatprep.subr.bf16.mxu0 %v1656_v0 }
 0x2c5   : > { %1213 = vmatpush2.bf16.msra.mxu0 %v1641_v9 }
 0x2c6   : > { %1214 = vmatprep.subr.bf16.mxu0 %v1656_v0 }
 0x2c9   : > { %1215 = vmatpush2.bf16.msra.mxu0 %v1642_v10 }
 0x2ca   : > { %1216 = vmatprep.subr.bf16.mxu0 %v1656_v0 }
 0x2cd   : > { %1217 = vmatpush2.bf16.msra.mxu0 %v1643_v11 }
 0x31e   : > { %v797_v52 = vpop.permute.xlu1 %796  ;;  %v788_v53 = vpop.permute.xlu0 %787 }
 0x31f   : > { %v803_v56 = vsel %vm592_vm7, %v778_v41, %v788_v53  ;;  %v807_v12 = vsel %vm592_vm7, %v791_v54, %v797_v52  ;;  %v1645_v41 = vld [vmem:[%s2040_s9 + $0x10] sm:$0xff]  }
 0x320   : > { %1011 = vmatprep.mubr.bf16.mxu1 %v807_v12 }
 0x321   : > { %1012 = vmatmul.mubr.bf16.vlgmr.msra.gmra.mxu1 %v803_v56  ;;  %v1249_v56 = vrot.slane %v1661_v38, 2 }
 0x322   : > { %1547 = vmatpush3.bf16.msra.mxu1 %v1628_v55  ;;  %1554 = vmatprep.mubr.msk.bf16.mxu1 %vm1662_vm8, %v1661_v38  ;;  %v1239_v55 = vrot.slane %v1661_v38, 1 }
 0x323   : > { %1548 = vmatprep.subr.bf16.mxu1 %v1661_v38 }
 0x326   : > { %1549 = vmatpush3.bf16.msra.mxu1 %v1629_v57 }
 0x327   : > { %1550 = vmatprep.subr.bf16.mxu1 %v1661_v38 }
 0x32a   : > { %1551 = vmatpush3.bf16.msra.mxu1 %v1630_v58 }
 0x32b   : > { %1552 = vmatprep.subr.bf16.mxu1 %v1661_v38 }
 0x32e   : > { %1553 = vmatpush3.bf16.msra.mxu1 %v1631_v59 }
 0x32f   : > { %1558 = vmatprep.subr.bf16.mxu1 %v1661_v38 }
 0x331   : > { %1555 = vmatmul.mubr.msk.bf16.vlgmr.msra.gmra.mxu1 %vm592_vm7, %v801_v61 }
 0x332   : > { %1566 = vmatprep.mubr.msk.bf16.mxu1 %vm1662_vm8, %v1661_v38  ;;  %1559 = vmatpush3.bf16.msra.mxu1 %v1644_v40 }
 0x333   : > { %1560 = vmatprep.subr.bf16.mxu1 %v1661_v38 }
 0x336   : > { %1561 = vmatpush3.bf16.msra.mxu1 %v1645_v41 }
 0x337   : > { %1562 = vmatprep.subr.bf16.mxu1 %v1661_v38 }
 0x3e1   : > { %v1530_v13 = vpop.f32.mrf.mxu1 }
 0x3e3   : > { %v1531_v14 = vpop.f32.mrf.mxu1 }
 0x3e4   : > { %v1532_v17 = vadd.f32 %v1531_v14, %v1530_v13  ;;  %v1482_v14 = vld [vmem:[%s2041_s10] ss:$0 sm:$0xff] }
 0x3e5   : > { %v1533_v15 = vpop.f32.mrf.mxu1 }
 0x3e6   : > { %v1014_v21 = vadd.f32 %v1532_v17, %v1446_v18 }
 0x3e7   : > { %v1534_v16 = vpop.f32.mrf.mxu1 }
 0x3e8   : > { %v1535_v19 = vadd.f32 %v1534_v16, %v1533_v15 }
 0x3ea   : > { %v1017_v24 = vadd.f32 %v1535_v19, %v1446_v18 }
 0x3f1   : > { %v1054_v20 = vpop.f32.mrf.mxu1 }
 0x3f2   : > { %v1055_v23 = vadd.f32 %v1054_v20, %v1014_v21 }
 0x3f3   : > { %v1556_v22 = vpop.f32.mrf.mxu1 }
 0x3f4   : > { %v1061_v0 = vmax.f32 %v1055_v23, 0.0 }
 0x3f5   : > { %v1057_v25 = vpop.f32.mrf.mxu1 }
 0x3f6   : > { %v1058_v26 = vadd.f32 %v1057_v25, %v1017_v24 }
 0x3f7   : > { %v1557_v27 = vpop.f32.mrf.mxu1 }
 0x3f8   : > { %v1062_v28 = vmax.f32 %v1058_v26, 0.0 }
 0x3fa   : > { %v1063_v29 = vpack.c.bf16 %v1062_v28, %v1061_v0 }
 0x3fc   : > { %v1075_v30 = vrot.slane %v1063_v29, 1  ;;  %v1067_v31 = vshll.u32 %v1063_v29, 16  ;;  %v1065_v33 = vshrl.u32 %v1063_v29, 16 }
 0x3fe   : > { %v1076_v32 = vsel %vm411_vm2, %v1075_v30, %v1749_v7  ;;  %v1069_v34 = vrot.slane %v1067_v31, 1 }
 0x3ff   : > { %1481 = vmatprep.mubr.msk.bf16.mxu0 %vm592_vm7, %v1076_v32 }
 0x400   : > { %v1070_v35 = vor.u32 %v1069_v34, %v1065_v33 }
 0x402   : > { %v1071_v36 = vsel %vm395_vm0, %v1070_v35, %v1749_v7  ;;  %v1646_v7 = vld [vmem:[%s2040_s9 + $0x8] sm:$0xff]  }
 0x403   : > { %1072 = vrot.lane.b32.xlu1 %v1071_v36, %s1660_s29  ;;  %1563 = vmatpush3.bf16.msra.mxu1 %v1646_v7 }
 0x404   : > { %1564 = vmatprep.subr.bf16.mxu1 %v1661_v38 }
 0x407   : > { %1565 = vmatpush3.bf16.msra.mxu1 %v1647_v42 }
 0x475   : > { %v1073_v37 = vpop.permute.xlu1 %1072 }
 0x476   : > { %v1078_v39 = vsel %vm592_vm7, %v1063_v29, %v1073_v37 }
 0x477   : > { %1219 = vmatmul.mubr.bf16.vlgmr.msra.gmra.mxu0 %v1078_v39 }
 0x537   : > { %v1220_v44 = vpop.f32.mrf.mxu0 }
 0x538   : > { %v1221_v46 = vadd.f32 %v1468_v43, %v1220_v44 }
 0x539   : > { %v1222_v45 = vpop.f32.mrf.mxu0 }
 0x53a   : > { %v1227_v50 = vmax.f32 %v1221_v46, 0.0 }
 0x53b   : > { %v1223_v47 = vpop.f32.mrf.mxu0 }
 0x53c   : > { %v1224_v48 = vadd.f32 %v1468_v43, %v1223_v47 }
 0x53d   : > { %v1225_v49 = vpop.f32.mrf.mxu0 }
 0x53e   : > { %v1228_v51 = vmax.f32 %v1224_v48, 0.0 }
 0x540   : > { %v1229_v52 = vpack.c.bf16 %v1228_v51, %v1227_v50 }
 0x542   : > { %v1230_v53 = vunpack.c.l.bf16 %v1229_v52  ;;  %v1231_v54 = vunpack.c.h.bf16 %v1229_v52 }
 0x544   : > { %v1236_v12 = vrot.slane %v1230_v53, 1  ;;  %v1237_v57 = vrot.slane %v1231_v54, 1  ;;  %v1246_v58 = vrot.slane %v1230_v53, 2  ;;  %v1247_v59 = vrot.slane %v1231_v54, 2 }
 0x545   : > { %v1256_v63 = vrot.slane %v1230_v53, 3  ;;  %v1257_v4 = vrot.slane %v1231_v54, 3 }
 0x546   : > { %v1238_v61 = vsel %vm411_vm2, %v1236_v12, %v1237_v57  ;;  %v1240_v62 = vsel %vm411_vm2, %v1237_v57, %v1239_v55  ;;  %v1248_v3 = vsel %vm798_vm9, %v1246_v58, %v1247_v59  ;;  %v1250_v5 = vsel %vm798_vm9, %v1247_v59, %v1249_v56 }
 0x547   : > { %v1243_v1 = vadd.f32 %v1238_v61, %v1230_v53  ;;  %v1244_v2 = vadd.f32 %v1240_v62, %v1231_v54  ;;  %v1258_v9 = vsel %vm1255_vm10, %v1256_v63, %v1257_v4  ;;  %v1260_v10 = vsel %vm1255_vm10, %v1257_v4, %v1259_v60 }
 0x549   : > { %v1253_v6 = vadd.f32 %v1248_v3, %v1243_v1  ;;  %v1254_v8 = vadd.f32 %v1250_v5, %v1244_v2 }
 0x54b   : > { %v1263_v11 = vadd.f32 %v1258_v9, %v1253_v6  ;;  %v1264_v38 = vadd.f32 %v1260_v10, %v1254_v8 }
 0x54d   : > { %v1265_v13 = vpack.c.bf16 %v1264_v38, %v1263_v11 }
 0x54f   : > { %1567 = vmatmul.mubr.msk.bf16.vlgmr.msra.gmra.mxu1 %vm592_vm7, %v1265_v13 }
 0x60f   : > { %v1342_v15 = vpop.f32.mrf.mxu1 }
 0x610   : > { %v1343_v16 = vadd.f32 %v1482_v14, %v1342_v15 }
 0x611   : > { %v1568_v17 = vpop.f32.mrf.mxu1 }
 0x612   : > { %1350 = vst.msk [vmem:[%s386_s13] sm:$0xff] %vm1349_vm11, %v1343_v16 }
 0x613   : > { %v1345_v18 = vpop.f32.mrf.mxu1 }
 0x614   : > { %v1346_v19 = vadd.f32 %v1482_v14, %v1345_v18 }
 0x615   : > { %v1569_v20 = vpop.f32.mrf.mxu1 }
 0x616   : > { %1351 = vst.msk [vmem:[%s386_s13 + $0x8] sm:$0xff] %vm1349_vm11, %v1346_v19 }
 0x617 PF: > { %s21_s17 = sadd.s32 1, %s1654_s17  }
 0x618   : > { %p18_p4 = scmp.ge.s32.totalorder %s21_s17, 4  }
 0x61a   :  { %20 = sbr.rel (!%p18_p4) target bundleno = 1 (0x1), region = 94 }

</bundles_post_ra>
